<compile_context>
chip_gen: v7x
topology: tpu7x:2x2x1
jax: 0.10.0
libtpu: 0.0.40
codegen_flags: <defaults>
</compile_context>

<pallas_src>
import functools

import jax
import jax.numpy as jnp
from jax.experimental import pallas as pl
from jax.experimental.pallas import tpu as pltpu

H1_PAD = 512        # 400 rounded up to a multiple of 128
H2_PAD = 384        # 300 rounded up to a multiple of 128
MAX_TB = 512        # largest streamed batch tile
VPU_L1_MAX_K = 16   # use VPU broadcast-FMA layer 1 when S+A <= this


def _round_up(n, m):
    return ((n + m - 1) // m) * m


def _cdiv(a, b):
    return (a + b - 1) // b


def _critic_kernel(x_ref, u_ref, w1x_ref, w1u_ref, b1_ref,
                   w2_ref, b2_ref, w3r_ref, b3_ref, out_ref,
                   *, s_dim, a_dim, use_vpu_l1):
    x = x_ref[...]                      # (TB, S)  f32
    u = u_ref[...]                      # (TB, A)  f32

    if use_vpu_l1:
        # layer 1 on the VPU: S+A broadcast FMAs, f32 throughout (exact).
        w1x = w1x_ref[...]              # (S, H1)  f32
        w1u = w1u_ref[...]              # (A, H1)  f32
        h1 = b1_ref[...]                # (1, H1)  f32, broadcasts over TB
        for k in range(s_dim):
            h1 = h1 + x[:, k:k + 1] * w1x[k:k + 1, :]
        for k in range(a_dim):
            h1 = h1 + u[:, k:k + 1] * w1u[k:k + 1, :]
    else:
        # layer 1 on the MXU (large S+A): bf16 operands, f32 accumulation.
        h1 = (jnp.dot(x.astype(jnp.bfloat16), w1x_ref[...],
                      preferred_element_type=jnp.float32)
              + jnp.dot(u.astype(jnp.bfloat16), w1u_ref[...],
                        preferred_element_type=jnp.float32)
              + b1_ref[...])
    h1 = jnp.maximum(h1, 0.0)           # (TB, H1) f32

    # layer 2: bf16 MXU matmul with f32 accumulation; bias/relu in f32.
    h2 = jnp.dot(h1.astype(jnp.bfloat16), w2_ref[...],
                 preferred_element_type=jnp.float32) + b2_ref[...]
    h2 = jnp.maximum(h2, 0.0)           # (TB, H2) f32

    # layer 3: N=1 head -> VPU multiply + lane reduction (skip the MXU).
    q = jnp.sum(h2 * w3r_ref[...], axis=-1, keepdims=True) + b3_ref[...]
    out_ref[...] = q.astype(out_ref.dtype)


def critic_forward(x, u, padded_params):
    """x: (B, state_dim), u: (B, action_dim). Returns (B, 1) Q-values."""
    w1x, w1u, b1, w2, b2, w3r, b3 = padded_params
    x = x.astype(jnp.float32)
    u = u.astype(jnp.float32)
    B, S = x.shape
    A = u.shape[1]
    use_vpu_l1 = (S + A) <= VPU_L1_MAX_K   # must match pad_critic_params

    # Batch tiling: multiple of 8 sublanes; >= 2 grid steps once B_pad >= 16 so
    # both v7x TensorCores get work; tiles up to 512 rows with an even step count.
    B_pad = _round_up(max(B, 8), 8)
    if B_pad < 16:
        TB = B_pad                                     # single tiny tile
    else:
        nsteps = 2 * _cdiv(B_pad, 2 * MAX_TB)          # even, >= 2
        TB = _round_up(_cdiv(B_pad, nsteps), 8)        # <= MAX_TB by construction
        B_pad = nsteps * TB
    if B_pad != B:
        x = jnp.pad(x, ((0, B_pad - B), (0, 0)))
        u = jnp.pad(u, ((0, B_pad - B), (0, 0)))

    batch_spec = lambda shape: pl.BlockSpec(shape, lambda i: (i, 0))   # streamed
    resident = lambda shape: pl.BlockSpec(shape, lambda i: (0, 0))     # VMEM-resident

    kernel = functools.partial(_critic_kernel, s_dim=S, a_dim=A,
                               use_vpu_l1=use_vpu_l1)

    out = pl.pallas_call(
        kernel,
        out_shape=jax.ShapeDtypeStruct((B_pad, 1), jnp.float32),
        grid=(B_pad // TB,),
        in_specs=[
            batch_spec((TB, S)),            # x tile
            batch_spec((TB, A)),            # u tile
            resident((S, H1_PAD)),          # w1 (state rows)
            resident((A, H1_PAD)),          # w1 (action rows)
            resident((1, H1_PAD)),          # b1
            resident((H1_PAD, H2_PAD)),     # w2 (bf16)
            resident((1, H2_PAD)),          # b2
            resident((1, H2_PAD)),          # w3 as a row vector
            resident((1, 1)),               # b3
        ],
        out_specs=batch_spec((TB, 1)),
        compiler_params=pltpu.CompilerParams(
            dimension_semantics=("parallel",),
            vmem_limit_bytes=16 << 20,
        ),
    )(x, u, w1x, w1u, b1, w2, b2, w3r, b3)

    return out if B_pad == B else out[:B]


def init_critic_params(key, state_dim, action_dim):
    """PyTorch-style init: uniform(-1/sqrt(fan_in), 1/sqrt(fan_in)); unpadded shapes."""
    dims = [(state_dim + action_dim, 400), (400, 300), (300, 1)]
    params = []
    for (fan_in, fan_out) in dims:
        key, kw, kb = jax.random.split(key, 3)
        bound = 1.0 / jnp.sqrt(jnp.float32(fan_in))
        w = jax.random.uniform(kw, (fan_in, fan_out), jnp.float32, -bound, bound)
        b = jax.random.uniform(kb, (1, fan_out), jnp.float32, -bound, bound)
        params += [w, b]
    return tuple(params)


def pad_critic_params(params, state_dim, action_dim):
    """Split w1 into (state, action) halves and zero-pad hidden dims to 512/384.

    Zero padding is exact: padded h1/h2 lanes are relu(0) = 0 and the padded
    weight rows/cols are 0.  w2 (and w1 on the MXU path) are stored in bf16 to
    feed the MXU single-pass; biases / w3 stay f32 for the VPU/XLU work.
    """
    w1, b1, w2, b2, w3, b3 = params
    S, A = state_dim, action_dim
    h1, h2 = w1.shape[1], w2.shape[1]
    use_vpu_l1 = (S + A) <= VPU_L1_MAX_K
    w1_dt = jnp.float32 if use_vpu_l1 else jnp.bfloat16

    w1x = jnp.zeros((S, H1_PAD), w1_dt).at[:, :h1].set(w1[:S].astype(w1_dt))
    w1u = jnp.zeros((A, H1_PAD), w1_dt).at[:, :h1].set(w1[S:].astype(w1_dt))
    b1p = jnp.zeros((1, H1_PAD), jnp.float32).at[:, :h1].set(b1)
    w2p = jnp.zeros((H1_PAD, H2_PAD), jnp.bfloat16).at[:h1, :h2].set(
        w2.astype(jnp.bfloat16))
    b2p = jnp.zeros((1, H2_PAD), jnp.float32).at[:, :h2].set(b2)
    w3r = jnp.zeros((1, H2_PAD), jnp.float32).at[:, :h2].set(w3[:, 0][None, :])
    return (w1x, w1u, b1p, w2p, b2p, w3r, b3)


def critic_reference(x, u, params):
    """Plain-JAX f32 reference (unpadded params) for correctness checking."""
    w1, b1, w2, b2, w3, b3 = params
    h = jnp.concatenate([x, u], axis=1)
    h = jnp.maximum(h @ w1 + b1, 0.0)
    h = jnp.maximum(h @ w2 + b2, 0.0)
    return h @ w3 + b3


if __name__ == "__main__":
    # Pendulum-v1: state_dim=3, action_dim=1
    state_dim, action_dim = 3, 1

    key = jax.random.PRNGKey(0)
    kp, kx, ku = jax.random.split(key, 3)
    params = init_critic_params(kp, state_dim, action_dim)
    padded = pad_critic_params(params, state_dim, action_dim)

    # bf16 layer-2 matmul => tolerance vs the f32 reference is ~1e-3 scale.
    for batch in (32, 5):   # exercises both the 2-step grid and the single-tile path
        kx, kxi = jax.random.split(kx)
        ku, kui = jax.random.split(ku)
        x = jax.random.normal(kxi, (batch, state_dim), jnp.float32)
        u = jax.random.normal(kui, (batch, action_dim), jnp.float32)

        q = jax.block_until_ready(critic_forward(x, u, padded))
        q_ref = critic_reference(x, u, params)

        assert q.shape == (batch, 1)
        assert jnp.allclose(q, q_ref, atol=5e-2, rtol=5e-2), (q, q_ref)

    print("KERNEL_OK")
</pallas_src>

<mosaic_0001>
module attributes {stable_mosaic.version = 11 : i64} {
  func.func @_critic_kernel(%arg0: i32, %arg1: memref<16x3xf32, #tpu.memory_space<vmem>>, %arg2: memref<16x1xf32, #tpu.memory_space<vmem>>, %arg3: memref<3x512xf32, #tpu.memory_space<vmem>>, %arg4: memref<1x512xf32, #tpu.memory_space<vmem>>, %arg5: memref<1x512xf32, #tpu.memory_space<vmem>>, %arg6: memref<512x384xbf16, #tpu.memory_space<vmem>>, %arg7: memref<1x384xf32, #tpu.memory_space<vmem>>, %arg8: memref<1x384xf32, #tpu.memory_space<vmem>>, %arg9: memref<1x1xf32, #tpu.memory_space<vmem>>, %arg10: memref<16x1xf32, #tpu.memory_space<vmem>>) attributes {dimension_semantics = [#tpu.dimension_semantics<parallel>], iteration_bounds = array<i64: 2>, scalar_prefetch = 0 : i64, scratch_operands = 0 : i64, tpu.core_type = #tpu.core_type<tc>, window_params = [{transform_indices = @transform_0, window_bounds = array<i64: 16, 3>}, {transform_indices = @transform_1, window_bounds = array<i64: 16, 1>}, {pipeline_mode = #tpu.pipeline_mode<synchronous>, transform_indices = @transform_2, window_bounds = array<i64: 3, 512>}, {pipeline_mode = #tpu.pipeline_mode<synchronous>, transform_indices = @transform_3, window_bounds = array<i64: 1, 512>}, {pipeline_mode = #tpu.pipeline_mode<synchronous>, transform_indices = @transform_4, window_bounds = array<i64: 1, 512>}, {pipeline_mode = #tpu.pipeline_mode<synchronous>, transform_indices = @transform_5, window_bounds = array<i64: 512, 384>}, {pipeline_mode = #tpu.pipeline_mode<synchronous>, transform_indices = @transform_6, window_bounds = array<i64: 1, 384>}, {pipeline_mode = #tpu.pipeline_mode<synchronous>, transform_indices = @transform_7, window_bounds = array<i64: 1, 384>}, {pipeline_mode = #tpu.pipeline_mode<synchronous>, transform_indices = @transform_8, window_bounds = array<i64: 1, 1>}, {transform_indices = @transform_9, window_bounds = array<i64: 16, 1>}]} {
    %c0 = arith.constant 0 : index
    %c0_0 = arith.constant 0 : index
    %0 = vector.load %arg1[%c0, %c0_0] : memref<16x3xf32, #tpu.memory_space<vmem>>, vector<16x3xf32>
    %c0_1 = arith.constant 0 : index
    %c0_2 = arith.constant 0 : index
    %1 = vector.load %arg2[%c0_1, %c0_2] : memref<16x1xf32, #tpu.memory_space<vmem>>, vector<16x1xf32>
    %c0_3 = arith.constant 0 : index
    %c0_4 = arith.constant 0 : index
    %2 = vector.load %arg3[%c0_3, %c0_4] : memref<3x512xf32, #tpu.memory_space<vmem>>, vector<3x512xf32>
    %c0_5 = arith.constant 0 : index
    %c0_6 = arith.constant 0 : index
    %3 = vector.load %arg4[%c0_5, %c0_6] : memref<1x512xf32, #tpu.memory_space<vmem>>, vector<1x512xf32>
    %c0_7 = arith.constant 0 : index
    %c0_8 = arith.constant 0 : index
    %4 = vector.load %arg5[%c0_7, %c0_8] : memref<1x512xf32, #tpu.memory_space<vmem>>, vector<1x512xf32>
    %5 = vector.extract_strided_slice %0 {offsets = [0, 0], sizes = [16, 1], strides = [1, 1]} : vector<16x3xf32> to vector<16x1xf32>
    %6 = vector.extract_strided_slice %2 {offsets = [0, 0], sizes = [1, 512], strides = [1, 1]} : vector<3x512xf32> to vector<1x512xf32>
    %7 = vector.broadcast %5 : vector<16x1xf32> to vector<16x512xf32>
    %8 = vector.broadcast %6 : vector<1x512xf32> to vector<16x512xf32>
    %9 = arith.mulf %7, %8 : vector<16x512xf32>
    %10 = vector.broadcast %4 : vector<1x512xf32> to vector<16x512xf32>
    %11 = arith.addf %10, %9 : vector<16x512xf32>
    %12 = vector.extract_strided_slice %0 {offsets = [0, 1], sizes = [16, 1], strides = [1, 1]} : vector<16x3xf32> to vector<16x1xf32>
    %13 = vector.extract_strided_slice %2 {offsets = [1, 0], sizes = [1, 512], strides = [1, 1]} : vector<3x512xf32> to vector<1x512xf32>
    %14 = vector.broadcast %12 : vector<16x1xf32> to vector<16x512xf32>
    %15 = vector.broadcast %13 : vector<1x512xf32> to vector<16x512xf32>
    %16 = arith.mulf %14, %15 : vector<16x512xf32>
    %17 = arith.addf %11, %16 : vector<16x512xf32>
    %18 = vector.extract_strided_slice %0 {offsets = [0, 2], sizes = [16, 1], strides = [1, 1]} : vector<16x3xf32> to vector<16x1xf32>
    %19 = vector.extract_strided_slice %2 {offsets = [2, 0], sizes = [1, 512], strides = [1, 1]} : vector<3x512xf32> to vector<1x512xf32>
    %20 = vector.broadcast %18 : vector<16x1xf32> to vector<16x512xf32>
    %21 = vector.broadcast %19 : vector<1x512xf32> to vector<16x512xf32>
    %22 = arith.mulf %20, %21 : vector<16x512xf32>
    %23 = arith.addf %17, %22 : vector<16x512xf32>
    %24 = vector.broadcast %1 : vector<16x1xf32> to vector<16x512xf32>
    %25 = vector.broadcast %3 : vector<1x512xf32> to vector<16x512xf32>
    %26 = arith.mulf %24, %25 : vector<16x512xf32>
    %27 = arith.addf %23, %26 : vector<16x512xf32>
    %cst = arith.constant 0.000000e+00 : f32
    %28 = vector.broadcast %cst : f32 to vector<16x512xf32>
    %29 = arith.maximumf %27, %28 : vector<16x512xf32>
    %30 = arith.truncf %29 : vector<16x512xf32> to vector<16x512xbf16>
    %c0_9 = arith.constant 0 : index
    %c0_10 = arith.constant 0 : index
    %31 = vector.load %arg6[%c0_9, %c0_10] : memref<512x384xbf16, #tpu.memory_space<vmem>>, vector<512x384xbf16>
    %cst_11 = arith.constant dense<0.000000e+00> : vector<16x384xf32>
    %32 = tpu.matmul %30, %31, %cst_11 {dimension_numbers = #tpu.dot_dimension_numbers<[1], [0], [0], [1], [0, 0, 1, 1], [], []>} : vector<16x512xbf16>, vector<512x384xbf16>, vector<16x384xf32> -> vector<16x384xf32>
    %c0_12 = arith.constant 0 : index
    %c0_13 = arith.constant 0 : index
    %33 = vector.load %arg7[%c0_12, %c0_13] : memref<1x384xf32, #tpu.memory_space<vmem>>, vector<1x384xf32>
    %34 = vector.broadcast %33 : vector<1x384xf32> to vector<16x384xf32>
    %35 = arith.addf %32, %34 : vector<16x384xf32>
    %cst_14 = arith.constant 0.000000e+00 : f32
    %36 = vector.broadcast %cst_14 : f32 to vector<16x384xf32>
    %37 = arith.maximumf %35, %36 : vector<16x384xf32>
    %c0_15 = arith.constant 0 : index
    %c0_16 = arith.constant 0 : index
    %38 = vector.load %arg8[%c0_15, %c0_16] : memref<1x384xf32, #tpu.memory_space<vmem>>, vector<1x384xf32>
    %39 = vector.broadcast %38 : vector<1x384xf32> to vector<16x384xf32>
    %40 = arith.mulf %37, %39 : vector<16x384xf32>
    %cst_17 = arith.constant dense<0.000000e+00> : vector<16xf32>
    %41 = vector.multi_reduction <add>, %40, %cst_17 [1] : vector<16x384xf32> to vector<16xf32>
    %42 = vector.shape_cast %41 : vector<16xf32> to vector<16x1xf32>
    %c0_18 = arith.constant 0 : index
    %c0_19 = arith.constant 0 : index
    %43 = vector.load %arg9[%c0_18, %c0_19] : memref<1x1xf32, #tpu.memory_space<vmem>>, vector<1x1xf32>
    %44 = vector.broadcast %43 : vector<1x1xf32> to vector<16x1xf32>
    %45 = arith.addf %42, %44 : vector<16x1xf32>
    %c0_20 = arith.constant 0 : index
    %c0_21 = arith.constant 0 : index
    %46 = vector.load %arg10[%c0_20, %c0_21] : memref<16x1xf32, #tpu.memory_space<vmem>>, vector<16x1xf32>
    tpu.vector_store %arg10[%c0_20, %c0_21], %45 {strides = array<i32>} : memref<16x1xf32, #tpu.memory_space<vmem>>, vector<16x1xf32>,
    return
  }
  func.func @transform_0(%arg0: i32) -> (i32, i32) {
    %c0_i32 = arith.constant 0 : i32
    %c0_i32_0 = arith.constant 0 : i32
    return %arg0, %c0_i32 : i32, i32
  }
  func.func @transform_1(%arg0: i32) -> (i32, i32) {
    %c0_i32 = arith.constant 0 : i32
    %c0_i32_0 = arith.constant 0 : i32
    return %arg0, %c0_i32 : i32, i32
  }
  func.func @transform_2(%arg0: i32) -> (i32, i32) {
    %c0_i32 = arith.constant 0 : i32
    %c0_i32_0 = arith.constant 0 : i32
    %c0_i32_1 = arith.constant 0 : i32
    return %c0_i32, %c0_i32_0 : i32, i32
  }
  func.func @transform_3(%arg0: i32) -> (i32, i32) {
    %c0_i32 = arith.constant 0 : i32
    %c0_i32_0 = arith.constant 0 : i32
    %c0_i32_1 = arith.constant 0 : i32
    return %c0_i32, %c0_i32_0 : i32, i32
  }
  func.func @transform_4(%arg0: i32) -> (i32, i32) {
    %c0_i32 = arith.constant 0 : i32
    %c0_i32_0 = arith.constant 0 : i32
    %c0_i32_1 = arith.constant 0 : i32
    return %c0_i32, %c0_i32_0 : i32, i32
  }
  func.func @transform_5(%arg0: i32) -> (i32, i32) {
    %c0_i32 = arith.constant 0 : i32
    %c0_i32_0 = arith.constant 0 : i32
    %c0_i32_1 = arith.constant 0 : i32
    return %c0_i32, %c0_i32_0 : i32, i32
  }
  func.func @transform_6(%arg0: i32) -> (i32, i32) {
    %c0_i32 = arith.constant 0 : i32
    %c0_i32_0 = arith.constant 0 : i32
    %c0_i32_1 = arith.constant 0 : i32
    return %c0_i32, %c0_i32_0 : i32, i32
  }
  func.func @transform_7(%arg0: i32) -> (i32, i32) {
    %c0_i32 = arith.constant 0 : i32
    %c0_i32_0 = arith.constant 0 : i32
    %c0_i32_1 = arith.constant 0 : i32
    return %c0_i32, %c0_i32_0 : i32, i32
  }
  func.func @transform_8(%arg0: i32) -> (i32, i32) {
    %c0_i32 = arith.constant 0 : i32
    %c0_i32_0 = arith.constant 0 : i32
    %c0_i32_1 = arith.constant 0 : i32
    return %c0_i32, %c0_i32_0 : i32, i32
  }
  func.func @transform_9(%arg0: i32) -> (i32, i32) {
    %c0_i32 = arith.constant 0 : i32
    %c0_i32_0 = arith.constant 0 : i32
    return %arg0, %c0_i32 : i32, i32
  }
}

</mosaic_0001>

<bundles_post_ra>
// kernel: tpu_custom_call.1
= control target key start
LH: loop header
LB: loop body
LE: loop exit
PB: predicated region body
PF: predicated region fallthrough
CT: control target
= control target key end

     0   :  { %s2212_s0 = inlined_call_operand.vmem [shape: f32[32,3], index: 0, kind: input, shape index: {}]   ;;  %s2213_s1 = inlined_call_operand.vmem [shape: f32[32,1], index: 1, kind: input, shape index: {}]   ;;  %s2214_s2 = inlined_call_operand.vmem [shape: f32[3,512], index: 2, kind: input, shape index: {}]   ;;  %s2215_s3 = inlined_call_operand.vmem [shape: f32[1,512], index: 3, kind: input, shape index: {}]   ;;  %s2216_s4 = inlined_call_operand.vmem [shape: f32[1,512], index: 4, kind: input, shape index: {}]   ;;  %s2217_s5 = inlined_call_operand.hbm [shape: bf16[512,384], index: 5, kind: input, shape index: {}]   ;;  %s2218_s6 = inlined_call_operand.vmem [shape: f32[1,384], index: 6, kind: input, shape index: {}]   ;;  %s2219_s7 = inlined_call_operand.vmem [shape: f32[1,384], index: 7, kind: input, shape index: {}]   ;;  %s2220_s8 = inlined_call_operand.<no memory space> [shape: f32[1,1], index: 8, kind: input, shape index: {}]   ;;  %s2221_s9 = inlined_call_operand.vmem [shape: f32[32,1], index: 9, kind: output, shape index: {}]  }
   0x1   :  { %v14_v0 = vstv %s2220_s8 }
   0x2   :  { %15 = vst [vmem:[#allocation2] sm:$0x1] %v14_v0 }
   0x3   :  { %16 = vsyncpa [#allocation4], 0  ;;  %s2023_s11 = smov 0  }
   0x4 LB: > { %s1602_s12 = sadd.s32 4294967295, %s1962_s11   ;;  %p1604_p0 = scmp.ge.s32.totalorder %s1962_s11, 1  ;;  %s1962_s11 = sphi %s2023_s11, %s22_s11  }
   0x5   : > { %p252_p1 = scmp.lt.s32.totalorder %s1962_s11, 3  ;;  %s1964_s13 = smov [#allocation3]  }
   0x6   : > { %s273_s14 = sshll.u32 %s1964_s13, 4  ;;  %p2037_p3 = scmp.eq.s32.totalorder %s1602_s12, 0  ;;  %s274_s14 = int_to_ptr.vmem [resolvable:$true] %s273_s14 }
   0x7   : > { %p2031_p2 = pnand %p1604_p0, %p252_p1  ;;  %s1924_s19 = scalar_lea.hbm %s2217_s5, 12288 }
   0x8   : > { %s2226_s15 = scalar_select %p2037_p3, 1, 0 }
   0x9   : > { %s2225_s8 = scalar_select %p2031_p2, 1, 0 }
   0xa   : > { %p1770_p4 = pneg %p2031_p2  ;;  %p1925_p6 = scmp.ne.s32.totalorder %s2217_s5, %s1924_s19 }
   0xb   : > { %p1931_p10 = scmp.lt.u32.totalorder %s1924_s19, %s2217_s5 }
   0xc   : > { %p2045_p5 = pnand %p2037_p3, %p1770_p4 }
   0xe   : > { %p1926_p7 = pneg %p2045_p5 }
  0x10   : > { %p1927_p8 = pnand %p1926_p7, %p1925_p6 }
  0x12   : > { %p1928_p9 = pneg %p1927_p8 }
  0x14   : > { %p1933_p11 = pnand %p1931_p10, %p1928_p9 }
  0x16   : > { %1936 = shalt.err (!%p1933_p11)
}
  0x17   : > { %s1937_s24 = scalar_lea.vmem %s274_s14, 12288  ;;  %p1945_p1 = scmp.lt.s32.totalorder %s274_s14, %s274_s14 }
  0x18   : > { %p1938_p12 = scmp.ne.s32.totalorder %s274_s14, %s1937_s24  ;;  %p1946_p4 = scmp.lt.s32.totalorder %s1937_s24, %s1937_s24 }
  0x1a   : > { %p1940_p13 = pnand %p1938_p12, %p1926_p7  ;;  %p1947_p3 = por %p1946_p4, %p1945_p1 }
  0x1c   : > { %p1941_p0 = pneg %p1940_p13 }
  0x1e   : > { %p1948_p2 = pnand %p1947_p3, %p1941_p0 }
  0x20   : > { %1951 = shalt.err (!%p1948_p2)
}
  0x21   : > { %s1965_s25 = smov 192   ;;  %s1966_s26 = smov 12  }
  0x22   : > { %1773 = dma.hbm_to_vmem [thread:$0]  (!%p2045_p5), %s2217_s5, 12288, %s274_s14, [#allocation4], %s1965_s25, %s1965_s25, %s1966_s26  }
  0x23   : > { %p2228_p6 = scmp.ne.s32.totalorder %s2225_s8, 0 }
  0x24   : > { %p2229_p8 = scmp.ne.s32.totalorder (!%p2228_p6), %s2226_s15, 0 }
  0x25   : > { %316 = sbr.rel (%p2228_p6) target bundleno = 638 (0x27e), region = 56 }
  0x2c   : > { %1957 = dma.done.wait (%p2229_p8), [#allocation4], 12288  }
  0x2d   : > { %1959 = vsyncadd (%p2229_p8), [#allocation4], 4294955008  ;;  %s1609_s29 = sshll.u32 %s1602_s12, 1  ;;  %v1967_v1 = vmov 1   ;;  %v1968_v2 = vmov 0   ;;  %v1969_v10 = vmov 2   ;;  %v396_v58 = vlaneseq }
  0x2e   : > { %1791 = vset.pattern.permute.xlu1 %v1967_v1  ;;  %1790 = vset.pattern.permute.xlu0 %v1968_v2  ;;  %p358_p2 = scmp.lt.s32.totalorder %s1609_s29, 3  ;;  %v1796_v5 = vld [vmem:[#allocation3 + $0x4] ss:$12 sps:$4 sm:$0xff]   ;;  %v1798_v6 = vld [vmem:[#allocation3] ss:$12 sps:$4 sm:$0xff]   ;;  %vm1519_vm0 = vcmask 7168  }
  0x2f   : > { %v1799_v7 = vld [vmem:[#allocation3 + $0x1c] ss:$12 sps:$4 sm:$0xff]   ;;  %1305 = vmatprep.subr.bf16.mxu0 %v1796_v5  ;;  %v1801_v8 = vld [vmem:[#allocation3 + $0x18] ss:$12 sps:$4 sm:$0xff]   ;;  %v1802_v9 = vld [vmem:[#allocation3 + $0x34] ss:$12 sps:$4 sm:$0xff]  }
  0x30   : > { %s2231_s29 = smov (!%p358_p2, %s1609_s29), 3  ;;  %1306 = vmatpush1.bf16.msra.mxu0 %v1798_v6  ;;  %v1804_v13 = vld [vmem:[#allocation3 + $0x30] ss:$12 sps:$4 sm:$0xff]   ;;  %v1805_v14 = vld [vmem:[#allocation3 + $0x4c] ss:$12 sps:$4 sm:$0xff]   ;;  %v397_v59 = vshrl.u32 %v396_v58, 7 }
  0x31   : > { %s2073_s30 = sshll.u32 %s2231_s29, 3  ;;  %1307 = vmatprep.subr.bf16.mxu0 %v1799_v7  ;;  %v1822_v15 = vld [vmem:[#allocation3 + $0xc8] ss:$12 sps:$4 sm:$0xff]   ;;  %v1808_v18 = vld [vmem:[#allocation3 + $0x64] ss:$12 sps:$4 sm:$0xff]  }
  0x32   : > { %s361_s14 = scalar_lea.vmem %s2212_s0, %s2073_s30  ;;  %s367_s15 = scalar_lea.vmem %s2213_s1, %s2073_s30  ;;  %v1824_v16 = vld [vmem:[#allocation3 + $0x8] ss:$12 sps:$4 sm:$0xff]   ;;  %1714 = vmatprep.subr.bf16.mxu1 %v1822_v15  ;;  %v1827_v19 = vld [vmem:[#allocation3 + $0xe0] ss:$12 sps:$4 sm:$0xff]   ;;  %v1832_v23 = vld [vmem:[#allocation3 + $0xf8] ss:$12 sps:$4 sm:$0xff]  }
  0x33   : > { %v376_v3 = vld [vmem:[%s361_s14] sm:$0xff]  ;;  %v377_v4 = vld [vmem:[%s361_s14 + $0x8] sm:$0xff]  ;;  %1715 = vmatpush3.bf16.msra.mxu1 %v1824_v16  ;;  %v2083_v60 = vsub.s32 0, %v397_v59  ;;  %v402_v62 = vsub.s32 4, %v397_v59  ;;  %v2094_v1 = vsub.s32 1, %v397_v59  ;;  %v2098_v7 = vsub.s32 2, %v397_v59  ;;  %s373_s10 = scalar_lea.vmem %s2221_s9, %s2073_s30 }
  0x34   : > { %470 = vperm.xlu1 %1791, %v376_v3   ;;  %386 = vperm.xlu0 %1790, %v376_v3   ;;  %v378_v11 = vld [vmem:[%s367_s15] sm:$0xff]  ;;  %v379_v12 = vld [vmem:[%s367_s15 + $0x8] sm:$0xff]  ;;  %v455_v15 = vsub.s32 3, %v397_v59 }
  0x35   : > { %1308 = vmatpush1.bf16.msra.mxu0 %v1801_v8  ;;  %v1807_v17 = vld [vmem:[#allocation3 + $0x48] ss:$12 sps:$4 sm:$0xff]   ;;  %v1829_v20 = vld [vmem:[#allocation3 + $0x20] ss:$12 sps:$4 sm:$0xff]   ;;  %1716 = vmatprep.subr.bf16.mxu1 %v1827_v19  ;;  %v1834_v24 = vld [vmem:[#allocation3 + $0x38] ss:$12 sps:$4 sm:$0xff]  }
  0x36   : > { %1309 = vmatprep.subr.bf16.mxu0 %v1802_v9  ;;  %v1810_v21 = vld [vmem:[#allocation3 + $0x60] ss:$12 sps:$4 sm:$0xff]   ;;  %v1811_v22 = vld [vmem:[#allocation3 + $0x7c] ss:$12 sps:$4 sm:$0xff]   ;;  %v1813_v25 = vld [vmem:[#allocation3 + $0x78] ss:$12 sps:$4 sm:$0xff]  }
  0x37   : > { %1717 = vmatpush3.bf16.msra.mxu1 %v1829_v20  ;;  %v1837_v26 = vld [vmem:[#allocation3 + $0x110] ss:$12 sps:$4 sm:$0xff]   ;;  %v1814_v27 = vld [vmem:[#allocation3 + $0x94] ss:$12 sps:$4 sm:$0xff]   ;;  %v1817_v30 = vld [vmem:[#allocation3 + $0xac] ss:$12 sps:$4 sm:$0xff]  }
  0x38   : > { %474 = vperm.xlu1 %1791, %v377_v4   ;;  %391 = vperm.xlu0 %1790, %v377_v4   ;;  %v1839_v28 = vld [vmem:[#allocation3 + $0x50] ss:$12 sps:$4 sm:$0xff]   ;;  %v1842_v31 = vld [vmem:[#allocation3 + $0x128] ss:$12 sps:$4 sm:$0xff]   ;;  %v1847_v34 = vld [vmem:[#allocation3 + $0x140] ss:$12 sps:$4 sm:$0xff]  }
  0x39   : > { %1310 = vmatpush1.bf16.msra.mxu0 %v1804_v13  ;;  %1718 = vmatprep.subr.bf16.mxu1 %v1832_v23  ;;  %v1816_v29 = vld [vmem:[#allocation3 + $0x90] ss:$12 sps:$4 sm:$0xff]   ;;  %v1844_v32 = vld [vmem:[#allocation3 + $0x68] ss:$12 sps:$4 sm:$0xff]   ;;  %v1849_v36 = vld [vmem:[#allocation3 + $0x80] ss:$12 sps:$4 sm:$0xff]  }
  0x3a   : > { %1311 = vmatprep.subr.bf16.mxu0 %v1805_v14  ;;  %v1819_v33 = vld [vmem:[#allocation3 + $0xa8] ss:$12 sps:$4 sm:$0xff]   ;;  %v1820_v35 = vld [vmem:[#allocation3 + $0xc4] ss:$12 sps:$4 sm:$0xff]   ;;  %v1823_v37 = vld [vmem:[#allocation3 + $0xc0] ss:$12 sps:$4 sm:$0xff]  }
  0x3b   : > { %1719 = vmatpush3.bf16.msra.mxu1 %v1834_v24  ;;  %v1852_v38 = vld [vmem:[#allocation3 + $0x158] ss:$12 sps:$4 sm:$0xff]   ;;  %v1825_v39 = vld [vmem:[#allocation3 + $0xdc] ss:$12 sps:$4 sm:$0xff]   ;;  %v1830_v43 = vld [vmem:[#allocation3 + $0xf4] ss:$12 sps:$4 sm:$0xff]  }
  0x3c   : > { %1793 = vset.pattern.permute.xlu1 %v1969_v10  ;;  %1792 = vset.pattern.permute.xlu0 %v1969_v10  ;;  %v1854_v40 = vld [vmem:[#allocation3 + $0x98] ss:$12 sps:$4 sm:$0xff]   ;;  %v1857_v41 = vld [vmem:[#allocation3 + $0x170] ss:$12 sps:$4 sm:$0xff]   ;;  %v1863_v45 = vld [vmem:[#allocation3 + $0x248] ss:$12 sps:$4 sm:$0xff]  }
  0x3d   : > { %534 = vperm.xlu1 %1793, %v377_v4   ;;  %530 = vperm.xlu0 %1792, %v376_v3   ;;  %v1828_v42 = vld [vmem:[#allocation3 + $0xd8] ss:$12 sps:$4 sm:$0xff]   ;;  %v1859_v44 = vld [vmem:[#allocation3 + $0xb0] ss:$12 sps:$4 sm:$0xff]   ;;  %v1838_v48 = vld [vmem:[#allocation3 + $0x108] ss:$12 sps:$4 sm:$0xff]  }
  0x3e   : > { %1312 = vmatpush1.bf16.msra.mxu0 %v1807_v17  ;;  %1720 = vmatprep.subr.bf16.mxu1 %v1837_v26  ;;  %v1833_v46 = vld [vmem:[#allocation3 + $0xf0] ss:$12 sps:$4 sm:$0xff]   ;;  %v1835_v47 = vld [vmem:[#allocation3 + $0x10c] ss:$12 sps:$4 sm:$0xff]   ;;  %v1850_v53 = vld [vmem:[#allocation3 + $0x154] ss:$12 sps:$4 sm:$0xff]  }
  0x3f   : > { %1313 = vmatprep.subr.bf16.mxu0 %v1808_v18  ;;  %1721 = vmatpush3.bf16.msra.mxu1 %v1839_v28  ;;  %v1840_v49 = vld [vmem:[#allocation3 + $0x124] ss:$12 sps:$4 sm:$0xff]   ;;  %v1843_v50 = vld [vmem:[#allocation3 + $0x120] ss:$12 sps:$4 sm:$0xff]   ;;  %v1845_v51 = vld [vmem:[#allocation3 + $0x13c] ss:$12 sps:$4 sm:$0xff]  }
  0x40   : > { %1722 = vmatprep.subr.bf16.mxu1 %v1842_v31  ;;  %v1848_v52 = vld [vmem:[#allocation3 + $0x138] ss:$12 sps:$4 sm:$0xff]   ;;  %v1853_v54 = vld [vmem:[#allocation3 + $0x150] ss:$12 sps:$4 sm:$0xff]   ;;  %v1858_v56 = vld [vmem:[#allocation3 + $0x168] ss:$12 sps:$4 sm:$0xff]  }
  0x41   : > { %1794 = vset.pattern.permute.xlu1 %v1968_v2  ;;  %1795 = vset.pattern.permute.xlu0 %v1968_v2  ;;  %v1855_v55 = vld [vmem:[#allocation3 + $0x16c] ss:$12 sps:$4 sm:$0xff]   ;;  %v1862_v57 = vld [vmem:[#allocation3 + $0x184] ss:$12 sps:$4 sm:$0xff]   ;;  %v483_v2 = vsub.s32 5, %v397_v59  ;;  %v543_v4 = vsub.s32 6, %v397_v59 }
  0x42   : > { %591 = vperm.xlu1 %1794, %v378_v11   ;;  %596 = vperm.xlu0 %1795, %v379_v12   ;;  %v380_v61 = vld [vmem:[%s2214_s2] sm:$0x77]  ;;  %v2091_v63 = vld [vmem:[%s2214_s2 + $0x8] sm:$0x77] }
  0x43   : > { %1314 = vmatpush1.bf16.msra.mxu0 %v1810_v21  ;;  %1723 = vmatpush3.bf16.msra.mxu1 %v1844_v32  ;;  %v399_v0 = vrot.slane %v380_v61, %v2083_v60  ;;  %v403_v3 = vrot.slane %v380_v61, %v402_v62  ;;  %v411_v5 = vrot.slane %v2091_v63, %v402_v62  ;;  %v2107_v12 = vld [vmem:[%s2216_s4] sm:$0xf] }
  0x44   : > { %1315 = vmatprep.subr.bf16.mxu0 %v1811_v22  ;;  %1724 = vmatprep.subr.bf16.mxu1 %v1847_v34  ;;  %v480_v8 = vrot.slane %v380_v61, %v2094_v1  ;;  %v484_v9 = vrot.slane %v380_v61, %v483_v2  ;;  %v492_v10 = vrot.slane %v2091_v63, %v483_v2  ;;  %v2130_v28 = vld [vmem:[%s2215_s3] sm:$0xf] }
  0x45   : > { %v419_v6 = vrot.slane %v399_v0, %v2083_v60  ;;  %v423_v14 = vrot.slane %v403_v3, %v2083_v60  ;;  %v540_v16 = vrot.slane %v380_v61, %v2098_v7  ;;  %v544_v17 = vrot.slane %v380_v61, %v543_v4 }
  0x46   : > { %v431_v18 = vrot.slane %v411_v5, %v2083_v60  ;;  %v444_v19 = vrot.slane %v2107_v12, %v2083_v60  ;;  %v552_v21 = vrot.slane %v2091_v63, %v543_v4  ;;  %v500_v22 = vrot.slane %v480_v8, %v2094_v1 }
  0x47   : > { %1316 = vmatpush1.bf16.msra.mxu0 %v1813_v25  ;;  %1725 = vmatpush3.bf16.msra.mxu1 %v1849_v36  ;;  %v504_v23 = vrot.slane %v484_v9, %v2094_v1  ;;  %v512_v24 = vrot.slane %v492_v10, %v2094_v1  ;;  %v448_v25 = vrot.slane %v2107_v12, %v2094_v1 }
  0x48   : > { %1317 = vmatprep.subr.bf16.mxu0 %v1814_v27  ;;  %1726 = vmatprep.subr.bf16.mxu1 %v1852_v38  ;;  %v560_v31 = vrot.slane %v540_v16, %v2098_v7  ;;  %v564_v32 = vrot.slane %v544_v17, %v2098_v7  ;;  %v572_v38 = vrot.slane %v552_v21, %v2098_v7 }
  0x4b   : > { %1318 = vmatpush1.bf16.msra.mxu0 %v1816_v29  ;;  %1727 = vmatpush3.bf16.msra.mxu1 %v1854_v40  ;;  %v456_v29 = vrot.slane %v2107_v12, %v455_v15  ;;  %v607_v40 = vrot.slane %v2130_v28, %v2094_v1 }
  0x4c   : > { %1319 = vmatprep.subr.bf16.mxu0 %v1817_v30  ;;  %1728 = vmatprep.subr.bf16.mxu1 %v1857_v41 }
  0x4f   : > { %1320 = vmatpush1.bf16.msra.mxu0 %v1819_v33  ;;  %1729 = vmatpush3.bf16.msra.mxu1 %v1859_v44 }
  0x50   : > { %1321 = vmatprep.subr.bf16.mxu0 %v1820_v35  ;;  %1736 = vmatprep.subr.bf16.mxu1 %v1863_v45 }
  0x53   : > { %1322 = vmatpush1.bf16.msra.mxu0 %v1823_v37 }
  0x54   : > { %1323 = vmatprep.subr.bf16.mxu0 %v1825_v39  ;;  %v603_v39 = vrot.slane %v2130_v28, %v2083_v60 }
  0x57   : > { %1324 = vmatpush1.bf16.msra.mxu0 %v1828_v42 }
  0x58   : > { %1325 = vmatprep.subr.bf16.mxu0 %v1830_v43 }
  0x5b   : > { %1326 = vmatpush1.bf16.msra.mxu0 %v1833_v46 }
  0x5c   : > { %1327 = vmatprep.subr.bf16.mxu0 %v1835_v47 }
  0x5f   : > { %1328 = vmatpush1.bf16.msra.mxu0 %v1838_v48 }
  0x60   : > { %1329 = vmatprep.subr.bf16.mxu0 %v1840_v49 }
  0x63   : > { %1330 = vmatpush1.bf16.msra.mxu0 %v1843_v50  ;;  %v615_v50 = vrot.slane %v2130_v28, %v455_v15 }
  0x64   : > { %1331 = vmatprep.subr.bf16.mxu0 %v1845_v51 }
  0x67   : > { %1332 = vmatpush1.bf16.msra.mxu0 %v1848_v52 }
  0x68   : > { %1333 = vmatprep.subr.bf16.mxu0 %v1850_v53 }
  0x6b   : > { %1334 = vmatpush1.bf16.msra.mxu0 %v1853_v54 }
  0x6c   : > { %1335 = vmatprep.subr.bf16.mxu0 %v1855_v55 }
  0x6f   : > { %1336 = vmatpush1.bf16.msra.mxu0 %v1858_v56 }
  0x70   : > { %1348 = vmatprep.subr.bf16.mxu0 %v1862_v57 }
  0xb3   : > { %v2102_v11 = vpop.permute.xlu1 %470  ;;  %v2109_v13 = vpop.permute.xlu0 %386 }
  0xb4   : > { %v432_v20 = vmul.f32 %v419_v6, %v2109_v13  ;;  %v433_v30 = vmul.f32 %v423_v14, %v2109_v13  ;;  %v435_v33 = vmul.f32 %v431_v18, %v2109_v13  ;;  %v513_v45 = vmul.f32 %v500_v22, %v2102_v11 }
  0xb5   : > { %v514_v55 = vmul.f32 %v504_v23, %v2102_v11  ;;  %v516_v59 = vmul.f32 %v512_v24, %v2102_v11 }
  0xb6   : > { %v461_v37 = vadd.f32 %v444_v19, %v432_v20  ;;  %v462_v46 = vadd.f32 %v448_v25, %v433_v30  ;;  %v464_v51 = vadd.f32 %v456_v29, %v435_v33 }
  0xb7   : > { %v2123_v26 = vpop.permute.xlu1 %474  ;;  %v2125_v27 = vpop.permute.xlu0 %391 }
  0xb8   : > { %v436_v34 = vmul.f32 %v419_v6, %v2125_v27  ;;  %v437_v35 = vmul.f32 %v423_v14, %v2125_v27  ;;  %v439_v36 = vmul.f32 %v431_v18, %v2125_v27  ;;  %v517_v41 = vmul.f32 %v500_v22, %v2123_v26 }
  0xb9   : > { %v520_v42 = vmul.f32 %v512_v24, %v2123_v26  ;;  %v518_v56 = vmul.f32 %v504_v23, %v2123_v26  ;;  %v521_v61 = vadd.f32 %v513_v45, %v461_v37  ;;  %v522_v3 = vadd.f32 %v514_v55, %v462_v46  ;;  %v1865_v46 = vld [vmem:[#allocation3 + $0x198] ss:$12 sps:$4 sm:$0xff]  }
  0xba   : > { %v465_v43 = vadd.f32 %v444_v19, %v436_v34  ;;  %v468_v44 = vadd.f32 %v456_v29, %v439_v36  ;;  %v466_v47 = vadd.f32 %v448_v25, %v437_v35  ;;  %v524_v8 = vadd.f32 %v516_v59, %v464_v51  ;;  %v1872_v51 = vld [vmem:[#allocation3 + $0x1b4] ss:$12 sps:$4 sm:$0xff]  }
  0xbc   : > { %v2148_v48 = vpop.permute.xlu1 %534  ;;  %v2150_v49 = vpop.permute.xlu0 %530  ;;  %v525_v52 = vadd.f32 %v517_v41, %v465_v43  ;;  %v528_v53 = vadd.f32 %v520_v42, %v468_v44  ;;  %v526_v4 = vadd.f32 %v518_v56, %v466_v47  ;;  %v1864_v43 = vld [vmem:[#allocation3 + $0x188] ss:$12 sps:$4 sm:$0xff]   ;;  %v1868_v44 = vld [vmem:[#allocation3 + $0x260] ss:$12 sps:$4 sm:$0xff]  }
  0xbd   : > { %v577_v54 = vmul.f32 %v560_v31, %v2148_v48  ;;  %v580_v57 = vmul.f32 %v572_v38, %v2148_v48  ;;  %v573_v58 = vmul.f32 %v560_v31, %v2150_v49  ;;  %v574_v62 = vmul.f32 %v564_v32, %v2150_v49  ;;  %v1869_v47 = vld [vmem:[#allocation3 + $0x1a0] ss:$12 sps:$4 sm:$0xff]  }
  0xbe   : > { %v576_v0 = vmul.f32 %v572_v38, %v2150_v49  ;;  %v578_v2 = vmul.f32 %v564_v32, %v2148_v48  ;;  %v1877_v56 = vld [vmem:[#allocation3 + $0x1cc] ss:$12 sps:$4 sm:$0xff]  }
  0xbf   : > { %v585_v5 = vadd.f32 %v577_v54, %v525_v52  ;;  %v588_v6 = vadd.f32 %v580_v57, %v528_v53  ;;  %v581_v9 = vadd.f32 %v573_v58, %v521_v61  ;;  %v582_v18 = vadd.f32 %v574_v62, %v522_v3  ;;  %v1873_v52 = vld [vmem:[#allocation3 + $0x278] ss:$12 sps:$4 sm:$0xff]   ;;  %v1870_v53 = vld [vmem:[#allocation3 + $0x1b0] ss:$12 sps:$4 sm:$0xff]   ;;  %v1875_v62 = vld [vmem:[#allocation3 + $0x1c8] ss:$12 sps:$4 sm:$0xff]  }
  0xc0   : > { %v584_v19 = vadd.f32 %v576_v0, %v524_v8  ;;  %v586_v23 = vadd.f32 %v578_v2, %v526_v4  ;;  %v1874_v54 = vld [vmem:[#allocation3 + $0x1b8] ss:$12 sps:$4 sm:$0xff]   ;;  %v1878_v57 = vld [vmem:[#allocation3 + $0x290] ss:$12 sps:$4 sm:$0xff]   ;;  %v488_v58 = vrot.slane %v2091_v63, %v2094_v1  ;;  %v548_v61 = vrot.slane %v2091_v63, %v2098_v7 }
  0xc1   : > { %v2162_v10 = vpop.permute.xlu1 %591  ;;  %v2164_v14 = vpop.permute.xlu0 %596  ;;  %v1879_v0 = vld [vmem:[#allocation3 + $0x1d0] ss:$12 sps:$4 sm:$0xff]   ;;  %v452_v2 = vrot.slane %v2107_v12, %v2098_v7  ;;  %v611_v12 = vrot.slane %v2130_v28, %v2098_v7 }
  0xc2   : > { %v620_v15 = vmul.f32 %v603_v39, %v2162_v10  ;;  %v621_v16 = vmul.f32 %v607_v40, %v2162_v10  ;;  %v623_v17 = vmul.f32 %v615_v50, %v2162_v10  ;;  %v624_v20 = vmul.f32 %v603_v39, %v2164_v14  ;;  %v1860_v39 = vld [vmem:[#allocation3 + $0x180] ss:$12 sps:$4 sm:$0xff]   ;;  %v1882_v4 = vld [vmem:[#allocation3 + $0x1e4] ss:$12 sps:$4 sm:$0xff]  }
  0xc3   : > { %v625_v21 = vmul.f32 %v607_v40, %v2164_v14  ;;  %v627_v22 = vmul.f32 %v615_v50, %v2164_v14  ;;  %v1867_v40 = vld [vmem:[#allocation3 + $0x19c] ss:$12 sps:$4 sm:$0xff]   ;;  %v407_v50 = vrot.slane %v2091_v63, %v2083_v60  ;;  %v1880_v63 = vld [vmem:[#allocation3 + $0x1e0] ss:$12 sps:$4 sm:$0xff]   ;;  %v626_v28 = vmul.f32 %v611_v12, %v2164_v14 }
  0xc4   : > { %v629_v24 = vadd.f32 %v621_v16, %v582_v18  ;;  %v628_v25 = vadd.f32 %v620_v15, %v581_v9  ;;  %v632_v29 = vadd.f32 %v624_v20, %v585_v5  ;;  %v631_v30 = vadd.f32 %v623_v17, %v584_v19  ;;  %v1883_v5 = vld [vmem:[#allocation3 + $0x2a8] ss:$12 sps:$4 sm:$0xff]   ;;  %v1888_v17 = vld [vmem:[#allocation3 + $0x2c0] ss:$12 sps:$4 sm:$0xff]   ;;  %v1899_v14 = vld [vmem:[#allocation3 + $0x230] ss:$12 sps:$4 sm:$0xff]  }
  0xc5   : > { %v635_v31 = vadd.f32 %v627_v22, %v588_v6  ;;  %v633_v32 = vadd.f32 %v625_v21, %v586_v23  ;;  %v427_v55 = vrot.slane %v407_v50, %v2083_v60  ;;  %v508_v6 = vrot.slane %v488_v58, %v2094_v1  ;;  %v1884_v9 = vld [vmem:[#allocation3 + $0x1e8] ss:$12 sps:$4 sm:$0xff]   ;;  %v1885_v22 = vld [vmem:[#allocation3 + $0x1f8] ss:$12 sps:$4 sm:$0xff]   ;;  %v1889_v23 = vld [vmem:[#allocation3 + $0x200] ss:$12 sps:$4 sm:$0xff]  }
  0xc6   : > { %v637_v33 = vmax.f32 %v629_v24, 0.0  ;;  %v636_v34 = vmax.f32 %v628_v25, 0.0  ;;  %v640_v35 = vmax.f32 %v632_v29, 0.0  ;;  %v639_v38 = vmax.f32 %v631_v30, 0.0  ;;  %v1892_v25 = vld [vmem:[#allocation3 + $0x214] ss:$12 sps:$4 sm:$0xff]  }
  0xc7   : > { %v641_v36 = vmax.f32 %v633_v32, 0.0  ;;  %v643_v41 = vmax.f32 %v635_v31, 0.0  ;;  %v438_v59 = vmul.f32 %v427_v55, %v2125_v27  ;;  %v434_v3 = vmul.f32 %v427_v55, %v2109_v13  ;;  %v1887_v13 = vld [vmem:[#allocation3 + $0x1fc] ss:$12 sps:$4 sm:$0xff]   ;;  %v1893_v29 = vld [vmem:[#allocation3 + $0x2d8] ss:$12 sps:$4 sm:$0xff]  }
  0xc8   : > { %v644_v37 = vpack.c.bf16 %v640_v35, %v636_v34  ;;  %v568_v27 = vrot.slane %v548_v61, %v2098_v7  ;;  %v519_v16 = vmul.f32 %v508_v6, %v2123_v26  ;;  %v515_v18 = vmul.f32 %v508_v6, %v2102_v11  ;;  %v1894_v31 = vld [vmem:[#allocation3 + $0x218] ss:$12 sps:$4 sm:$0xff]   ;;  %v1898_v34 = vld [vmem:[#allocation3 + $0x2f0] ss:$12 sps:$4 sm:$0xff]   ;;  %v1921_v55 = vld [vmem:[#allocation3 + $0x2e8] ss:$12 sps:$4 sm:$0xff]  }
  0xc9   : > { %v645_v42 = vpack.c.bf16 %v641_v36, %v637_v33  ;;  %v647_v45 = vpack.c.bf16 %v643_v41, %v639_v38  ;;  %v467_v8 = vadd.f32 %v452_v2, %v438_v59  ;;  %v463_v15 = vadd.f32 %v452_v2, %v434_v3  ;;  %v1897_v33 = vld [vmem:[#allocation3 + $0x22c] ss:$12 sps:$4 sm:$0xff]   ;;  %v1917_v50 = vld [vmem:[#allocation3 + $0x2bc] ss:$12 sps:$4 sm:$0xff]  }
  0xca   : > { %v579_v20 = vmul.f32 %v568_v27, %v2148_v48  ;;  %v575_v21 = vmul.f32 %v568_v27, %v2150_v49  ;;  %v622_v26 = vmul.f32 %v611_v12, %v2162_v10  ;;  %v1890_v48 = vld [vmem:[#allocation3 + $0x210] ss:$12 sps:$4 sm:$0xff]   ;;  %v1895_v10 = vld [vmem:[#allocation3 + $0x228] ss:$12 sps:$4 sm:$0xff]   ;;  %v1900_v38 = vld [vmem:[#allocation3 + $0x240] ss:$12 sps:$4 sm:$0xff]  }
  0xcb   : > { %1337 = vmatprep.mubr.bf16.mxu0 %v645_v42  ;;  %1423 = vmatprep.mubr.bf16.mxu1 %v645_v42  ;;  %v527_v19 = vadd.f32 %v519_v16, %v467_v8  ;;  %v523_v24 = vadd.f32 %v515_v18, %v463_v15  ;;  %v1905_v42 = vld [vmem:[#allocation3 + $0x25c] ss:$12 sps:$4 sm:$0xff]  }
  0xcc   : > { %1338 = vmatmul.mubr.bf16.vlgmr.msra.gmra.mrb[0].mxu0 %v644_v37  ;;  %1424 = vmatmul.mubr.bf16.vlgmr.msra.gmra.mrb[0].mxu1 %v644_v37  ;;  %v1902_v37 = vld [vmem:[#allocation3 + $0x244] ss:$12 sps:$4 sm:$0xff]   ;;  %v1479_v18 = vld [vmem:[%s2219_s7] sm:$0x7] }
  0xcd   : > { %1349 = vmatpush1.bf16.msra.mxu0 %v1860_v39  ;;  %1737 = vmatpush3.bf16.msra.mxu1 %v1864_v43  ;;  %v587_v30 = vadd.f32 %v579_v20, %v527_v19  ;;  %v583_v11 = vadd.f32 %v575_v21, %v523_v24  ;;  %v1903_v39 = vld [vmem:[#allocation3 + $0x258] ss:$12 sps:$4 sm:$0xff]   ;;  %v1908_v43 = vld [vmem:[#allocation3 + $0x274] ss:$12 sps:$4 sm:$0xff]   ;;  %v1484_v20 = vrot.slane %v1479_v18, %v2083_v60 }
  0xce   : > { %1380 = vmatprep.mubr.bf16.mxu0 %v647_v45  ;;  %1464 = vmatprep.mubr.bf16.mxu1 %v647_v45  ;;  %v1909_v45 = vld [vmem:[#allocation3 + $0x288] ss:$12 sps:$4 sm:$0xff]  }
  0xcf   : > { %1350 = vmatprep.subr.bf16.mxu0 %v1867_v40  ;;  %1738 = vmatprep.subr.bf16.mxu1 %v1868_v44  ;;  %v630_v49 = vadd.f32 %v622_v26, %v583_v11  ;;  %v634_v32 = vadd.f32 %v626_v28, %v587_v30  ;;  %v1906_v40 = vld [vmem:[#allocation3 + $0x270] ss:$12 sps:$4 sm:$0xff]   ;;  %v1911_v44 = vld [vmem:[#allocation3 + $0x28c] ss:$12 sps:$4 sm:$0xff]  }
  0xd1   : > { %1351 = vmatpush1.bf16.msra.mxu0 %v1865_v46  ;;  %1739 = vmatpush3.bf16.msra.mxu1 %v1869_v47  ;;  %v638_v35 = vmax.f32 %v630_v49, 0.0  ;;  %v642_v36 = vmax.f32 %v634_v32, 0.0  ;;  %v1914_v46 = vld [vmem:[#allocation3 + $0x2a4] ss:$12 sps:$4 sm:$0xff]   ;;  %v1912_v47 = vld [vmem:[#allocation3 + $0x2a0] ss:$12 sps:$4 sm:$0xff]  }
  0xd2   : > { %1352 = vmatprep.subr.bf16.mxu0 %v1872_v51  ;;  %1740 = vmatprep.subr.bf16.mxu1 %v1873_v52  ;;  %v1915_v51 = vld [vmem:[#allocation3 + $0x2b8] ss:$12 sps:$4 sm:$0xff]   ;;  %v1920_v52 = vld [vmem:[#allocation3 + $0x2d4] ss:$12 sps:$4 sm:$0xff]  }
  0xd3   : > { %v646_v41 = vpack.c.bf16 %v642_v36, %v638_v35 }
  0xd5   : > { %1353 = vmatpush1.bf16.msra.mxu0 %v1870_v53  ;;  %1741 = vmatpush3.bf16.msra.mxu1 %v1874_v54  ;;  %v1918_v53 = vld [vmem:[#allocation3 + $0x2d0] ss:$12 sps:$4 sm:$0xff]   ;;  %v1923_v54 = vld [vmem:[#allocation3 + $0x2ec] ss:$12 sps:$4 sm:$0xff]  }
  0xd6   : > { %1354 = vmatprep.subr.bf16.mxu0 %v1877_v56  ;;  %1742 = vmatprep.subr.bf16.mxu1 %v1878_v57 }
  0xd9   : > { %1355 = vmatpush1.bf16.msra.mxu0 %v1875_v62  ;;  %1743 = vmatpush3.bf16.msra.mxu1 %v1879_v0  ;;  %v776_v0 = vld [vmem:[%s2218_s6] sm:$0x7] }
  0xda   : > { %1356 = vmatprep.subr.bf16.mxu0 %v1882_v4  ;;  %1744 = vmatprep.subr.bf16.mxu1 %v1883_v5  ;;  %v789_v2 = vrot.slane %v776_v0, %v2098_v7  ;;  %v781_v12 = vrot.slane %v776_v0, %v2083_v60 }
  0xdd   : > { %1357 = vmatpush1.bf16.msra.mxu0 %v1880_v63  ;;  %1745 = vmatpush3.bf16.msra.mxu1 %v1884_v9 }
  0xde   : > { %1358 = vmatprep.subr.bf16.mxu0 %v1887_v13  ;;  %1746 = vmatprep.subr.bf16.mxu1 %v1888_v17  ;;  %v785_v13 = vrot.slane %v776_v0, %v2094_v1 }
  0xe1   : > { %1359 = vmatpush1.bf16.msra.mxu0 %v1885_v22  ;;  %1747 = vmatpush3.bf16.msra.mxu1 %v1889_v23  ;;  %v1488_v23 = vrot.slane %v1479_v18, %v2094_v1 }
  0xe2   : > { %1360 = vmatprep.subr.bf16.mxu0 %v1892_v25  ;;  %1748 = vmatprep.subr.bf16.mxu1 %v1893_v29 }
  0xe5   : > { %1361 = vmatpush1.bf16.msra.mxu0 %v1890_v48  ;;  %1749 = vmatpush3.bf16.msra.mxu1 %v1894_v31  ;;  %v1492_v48 = vrot.slane %v1479_v18, %v2098_v7 }
  0xe6   : > { %1362 = vmatprep.subr.bf16.mxu0 %v1897_v33  ;;  %1750 = vmatprep.subr.bf16.mxu1 %v1898_v34 }
  0xe9   : > { %1363 = vmatpush1.bf16.msra.mxu0 %v1895_v10  ;;  %1751 = vmatpush3.bf16.msra.mxu1 %v1899_v14 }
  0xea   : > { %1364 = vmatprep.subr.bf16.mxu0 %v1902_v37 }
  0xec   : > { %1465 = vmatmul.mubr.bf16.vlgmr.msra.gmra.mrb[4].mxu1 %v646_v41 }
  0xed   : > { %1365 = vmatpush1.bf16.msra.mxu0 %v1900_v38 }
  0xee   : > { %1366 = vmatprep.subr.bf16.mxu0 %v1905_v42 }
  0xf1   : > { %1367 = vmatpush1.bf16.msra.mxu0 %v1903_v39 }
  0xf2   : > { %1368 = vmatprep.subr.bf16.mxu0 %v1908_v43 }
  0xf5   : > { %1369 = vmatpush1.bf16.msra.mxu0 %v1906_v40 }
  0xf6   : > { %1370 = vmatprep.subr.bf16.mxu0 %v1911_v44 }
  0xf9   : > { %1371 = vmatpush1.bf16.msra.mxu0 %v1909_v45 }
  0xfa   : > { %1372 = vmatprep.subr.bf16.mxu0 %v1914_v46 }
  0xfd   : > { %1373 = vmatpush1.bf16.msra.mxu0 %v1912_v47 }
  0xfe   : > { %1374 = vmatprep.subr.bf16.mxu0 %v1917_v50 }
 0x101   : > { %1375 = vmatpush1.bf16.msra.mxu0 %v1915_v51 }
 0x102   : > { %1376 = vmatprep.subr.bf16.mxu0 %v1920_v52 }
 0x105   : > { %1377 = vmatpush1.bf16.msra.mxu0 %v1918_v53 }
 0x106   : > { %1378 = vmatprep.subr.bf16.mxu0 %v1923_v54 }
 0x109   : > { %1379 = vmatpush1.bf16.msra.mxu0 %v1921_v55 }
 0x10c   : > { %1381 = vmatmul.mubr.bf16.vlgmr.msra.gmra.mrb[0].mxu0 %v646_v41  ;;  %v1711_v41 = vld [vmem:[#allocation2] ss:$0 sm:$0xff] }
 0x19f   : > { %v1730_v56 = vpop.f32.mrb[0].mxu1 }
 0x1a0   : > { %v1731_v57 = vpop.f32.mrb[1].mxu1 }
 0x1a1   : > { %v1732_v58 = vadd.f32 %v1731_v57, %v1730_v56  ;;  %v1733_v59 = vpop.f32.mrb[2].mxu1 }
 0x1a2   : > { %v1734_v61 = vpop.f32.mrb[3].mxu1 }
 0x1a3   : > { %v1735_v62 = vadd.f32 %v1734_v61, %v1733_v59  ;;  %v1426_v5 = vadd.f32 %v1732_v58, %v789_v2 }
 0x1a5   : > { %v1429_v63 = vadd.f32 %v1735_v62, %v789_v2 }
 0x1bf   : > { %v1752_v3 = vpop.f32.mrb[4].mxu1 }
 0x1c0   : > { %v1753_v4 = vpop.f32.mrb[5].mxu1 }
 0x1c1   : > { %v1754_v6 = vadd.f32 %v1753_v4, %v1752_v3  ;;  %v1755_v8 = vpop.f32.mrb[6].mxu1 }
 0x1c2   : > { %v1756_v27 = vpop.f32.mrb[7].mxu1 }
 0x1c3   : > { %v1467_v9 = vadd.f32 %v1754_v6, %v1426_v5  ;;  %v1757_v15 = vadd.f32 %v1756_v27, %v1755_v8 }
 0x1c5   : > { %v1470_v16 = vadd.f32 %v1757_v15, %v1429_v63  ;;  %v1475_v29 = vmax.f32 %v1467_v9, 0.0 }
 0x1c7   : > { %v1478_v32 = vmax.f32 %v1470_v16, 0.0  ;;  %v1498_v14 = vmul.f32 %v1492_v48, %v1475_v29 }
 0x1c9   : > { %v1501_v36 = vmul.f32 %v1492_v48, %v1478_v32 }
 0x1df   : > { %v1382_v17 = vpop.f32.mrb[0].mxu0 }
 0x1e0   : > { %v1758_v19 = vadd.f32 %v1382_v17, %v781_v12  ;;  %v1384_v21 = vpop.f32.mrb[1].mxu0 }
 0x1e1   : > { %v1759_v22 = vadd.f32 %v1384_v21, %v785_v13  ;;  %v1386_v24 = vpop.f32.mrb[2].mxu0 }
 0x1e2   : > { %v1473_v26 = vmax.f32 %v1758_v19, 0.0  ;;  %v1760_v28 = vadd.f32 %v1386_v24, %v781_v12  ;;  %v1388_v25 = vpop.f32.mrb[3].mxu0 }
 0x1e3   : > { %v1474_v30 = vmax.f32 %v1759_v22, 0.0  ;;  %v1761_v11 = vadd.f32 %v1388_v25, %v785_v13 }
 0x1e4   : > { %v1496_v31 = vmul.f32 %v1484_v20, %v1473_v26  ;;  %v1476_v49 = vmax.f32 %v1760_v28, 0.0 }
 0x1e5   : > { %v1497_v33 = vmul.f32 %v1488_v23, %v1474_v30  ;;  %v1477_v34 = vmax.f32 %v1761_v11, 0.0 }
 0x1e6   : > { %v1499_v60 = vmul.f32 %v1484_v20, %v1476_v49 }
 0x1e7   : > { %v1500_v10 = vmul.f32 %v1488_v23, %v1477_v34  ;;  %v1502_v35 = vadd.f32 %v1497_v33, %v1496_v31 }
 0x1e9   : > { %v1503_v1 = vadd.f32 %v1502_v35, %v1498_v14  ;;  %v1506_v37 = vadd.f32 %v1500_v10, %v1499_v60 }
 0x1eb   : > { %1504 = vadd.xlane.f32.xlu1 %v1503_v1  ;;  %v1507_v38 = vadd.f32 %v1506_v37, %v1501_v36 }
 0x1ed   : > { %1508 = vadd.xlane.f32.xlu0 %v1507_v38 }
 0x278   : > { %v1505_v7 = vpop.xlane.xlu1 %1504 }
 0x279   : > { %v1517_v42 = vadd.f32 %v1711_v41, %v1505_v7 }
 0x27a   : > { %v1509_v39 = vpop.xlane.xlu0 %1508 }
 0x27b   : > { %1520 = vst.msk [vmem:[%s373_s10] sm:$0xff] %vm1519_vm0, %v1517_v42  ;;  %v1518_v43 = vadd.f32 %v1711_v41, %v1509_v39 }
 0x27d   : > { %1521 = vst.msk [vmem:[%s373_s10 + $0x8] sm:$0xff] %vm1519_vm0, %v1518_v43 }
 0x27e PF: > { %s22_s11 = sadd.s32 1, %s1962_s11  }
 0x27f   : > { %p19_p3 = scmp.ge.s32.totalorder %s22_s11, 4  }
 0x281   :  { %21 = sbr.rel (!%p19_p3) target bundleno = 4 (0x4), region = 94 }
 0x288   :  { %1544 = vsyncpa [#allocation4], 1 }
 0x289   :  { %1546 = vsyncpa [#allocation4 + $0x1], 1 }

</bundles_post_ra>
